<compile_context>
chip_gen: v7x
topology: tpu7x:2x2x1
jax: 0.10.0
libtpu: 0.0.40
codegen_flags: <defaults>
</compile_context>

<pallas_src>
import jax
import jax.numpy as jnp
from jax.experimental import pallas as pl
from jax.experimental.pallas import tpu as pltpu


def net_kernel(x_ref, p_ref, o_ref):
    # x_ref: (1, B)  -- batch on the lane axis.
    # p_ref: (H, 4)  -- packed parameter columns:
    #   col 0: hidden weight  w1[j]
    #   col 1: hidden bias    b1[j]
    #   col 2: predict weight w2[j]
    #   col 3: predict bias   b2 (replicated over sublanes)
    x = x_ref[...]                      # (1, B)
    w1 = p_ref[:, 0:1]                  # (H, 1)
    b1 = p_ref[:, 1:2]                  # (H, 1)
    w2 = p_ref[:, 2:3]                  # (H, 1)
    b2 = p_ref[0:1, 3:4]                # (1, 1)

    # First Linear (K == 1) + ReLU: pure VPU broadcast work -> (H, B).
    h = jnp.maximum(w1 * x + b1, 0.0)

    # Second Linear (N == 1): elementwise mul (VPU) + sublane reduce (XLU),
    # producing a lane-dense (1, B) row that stores without masking per row.
    o_ref[...] = jnp.sum(h * w2, axis=0, keepdims=True) + b2


def net_forward(x, params):
    """Forward pass.

    x:      [B, 1]  float32  (PyTorch-style column input)
    params: [H, 4]  float32  (packed columns: w1, b1, w2, b2-replicated)
    returns [B, 1]  float32
    """
    batch = x.shape[0]
    n_hidden = params.shape[0]

    # Layout plumbing only: put the batch on the lane axis.
    x_row = x.reshape(1, batch)

    # mul + add for layer 1, mul + reduce-add for layer 2 (per element).
    flops = 4 * batch * n_hidden
    bytes_accessed = 4 * (x.size + params.size + batch)

    y_row = pl.pallas_call(
        net_kernel,
        out_shape=jax.ShapeDtypeStruct((1, batch), jnp.float32),
        in_specs=[
            pl.BlockSpec(memory_space=pltpu.VMEM),   # x      (1, B) lane-dense
            pl.BlockSpec(memory_space=pltpu.VMEM),   # params (H, 4) single DMA
        ],
        out_specs=pl.BlockSpec(memory_space=pltpu.VMEM),
        cost_estimate=pl.CostEstimate(
            flops=flops, transcendentals=0, bytes_accessed=bytes_accessed),
    )(x_row, params)

    return y_row.reshape(batch, 1)
    # NOTE (scaling guidance from perf review):
    #  * This forward is overhead-bound at B=100; for real training fuse the
    #    whole step (forward + grad + SGD update, with input_output_aliases on
    #    the params) into one pallas_call instead of calling this standalone.
    #  * If B grows large, add a grid over the (lane-dense) batch axis with
    #    blocks that are multiples of 128 lanes and
    #    dimension_semantics=("parallel",).  Only v7x (2 TensorCores) gains
    #    from "parallel"; size per-buffer blocks against v7x's 64 MiB VMEM
    #    (32 MiB scoped default), i.e. keep blocks <= ~8 MiB.  On v6e prefer
    #    the biggest single block that fits VMEM (>=512 lanes per tile) before
    #    reaching for a finer grid.


def init_params(key, n_features, n_hidden, n_output=1):
    """torch.nn.Linear-style init (U(-1/sqrt(fan_in), 1/sqrt(fan_in))),
    packed into a single (H, 4) column array for one coalesced VMEM DMA.

    Returns (params, (w1, b1, w2, b2)) where the unpacked pieces are used only
    by the pure-JAX reference check.
    """
    assert n_features == 1 and n_output == 1, "kernel specialized for F=1, O=1"
    k1, k2, k3, k4 = jax.random.split(key, 4)
    bound1 = 1.0 / jnp.sqrt(jnp.float32(n_features))
    bound2 = 1.0 / jnp.sqrt(jnp.float32(n_hidden))
    w1 = jax.random.uniform(k1, (n_hidden,), jnp.float32, -bound1, bound1)
    b1 = jax.random.uniform(k2, (n_hidden,), jnp.float32, -bound1, bound1)
    w2 = jax.random.uniform(k3, (n_hidden,), jnp.float32, -bound2, bound2)
    b2 = jax.random.uniform(k4, (), jnp.float32, -bound2, bound2)
    params = jnp.stack(
        [w1, b1, w2, jnp.full((n_hidden,), b2, jnp.float32)], axis=1)  # (H, 4)
    return params, (w1, b1, w2, b2)


if __name__ == "__main__":
    # Matches the LineRegression script: x = unsqueeze(linspace(-1, 1, 100), 1)
    n_features, n_hidden, n_output = 1, 32, 1
    batch = 100

    key = jax.random.PRNGKey(0)
    params, (w1, b1, w2, b2) = init_params(key, n_features, n_hidden, n_output)

    x = jnp.linspace(-1.0, 1.0, batch, dtype=jnp.float32).reshape(batch, 1)

    y = net_forward(x, params)
    y = jax.block_until_ready(y)

    # Pure-JAX reference of the same forward pass (standard matmul form,
    # PyTorch Linear layout: hidden.weight (H,1), predict.weight (1,H)).
    h_ref = jnp.maximum(x @ w1.reshape(1, n_hidden) + b1, 0.0)   # (B, H)
    ref = h_ref @ w2.reshape(n_hidden, 1) + b2                   # (B, 1)

    assert y.shape == (batch, n_output)
    assert jnp.allclose(y, ref, atol=1e-5, rtol=1e-5)

    print("KERNEL_OK")
</pallas_src>

<mosaic_0001>
module attributes {stable_mosaic.version = 11 : i64} {
  func.func @net_kernel(%arg0: memref<1x100xf32, #tpu.memory_space<vmem>>, %arg1: memref<32x4xf32, #tpu.memory_space<vmem>>, %arg2: memref<1x100xf32, #tpu.memory_space<vmem>>) attributes {dimension_semantics = [], scalar_prefetch = 0 : i64, scratch_operands = 0 : i64, tpu.core_type = #tpu.core_type<tc>} {
    %c0 = arith.constant 0 : index
    %c0_0 = arith.constant 0 : index
    %0 = vector.load %arg0[%c0, %c0_0] : memref<1x100xf32, #tpu.memory_space<vmem>>, vector<1x100xf32>
    %c0_1 = arith.constant 0 : index
    %c0_2 = arith.constant 0 : index
    %1 = vector.load %arg1[%c0_1, %c0_2] : memref<32x4xf32, #tpu.memory_space<vmem>>, vector<32x1xf32>
    %c0_3 = arith.constant 0 : index
    %c1 = arith.constant 1 : index
    %2 = vector.load %arg1[%c0_3, %c1] : memref<32x4xf32, #tpu.memory_space<vmem>>, vector<32x1xf32>
    %c0_4 = arith.constant 0 : index
    %c2 = arith.constant 2 : index
    %3 = vector.load %arg1[%c0_4, %c2] : memref<32x4xf32, #tpu.memory_space<vmem>>, vector<32x1xf32>
    %c0_5 = arith.constant 0 : index
    %c3 = arith.constant 3 : index
    %4 = vector.load %arg1[%c0_5, %c3] : memref<32x4xf32, #tpu.memory_space<vmem>>, vector<1x1xf32>
    %5 = vector.broadcast %1 : vector<32x1xf32> to vector<32x100xf32>
    %6 = vector.broadcast %0 : vector<1x100xf32> to vector<32x100xf32>
    %7 = arith.mulf %5, %6 : vector<32x100xf32>
    %8 = vector.broadcast %2 : vector<32x1xf32> to vector<32x100xf32>
    %9 = arith.addf %7, %8 : vector<32x100xf32>
    %cst = arith.constant 0.000000e+00 : f32
    %10 = vector.broadcast %cst : f32 to vector<32x100xf32>
    %11 = arith.maximumf %9, %10 : vector<32x100xf32>
    %12 = vector.broadcast %3 : vector<32x1xf32> to vector<32x100xf32>
    %13 = arith.mulf %11, %12 : vector<32x100xf32>
    %cst_6 = arith.constant dense<0.000000e+00> : vector<100xf32>
    %14 = vector.multi_reduction <add>, %13, %cst_6 [0] : vector<32x100xf32> to vector<100xf32>
    %15 = vector.shape_cast %14 : vector<100xf32> to vector<1x100xf32>
    %16 = vector.broadcast %4 : vector<1x1xf32> to vector<1x100xf32>
    %17 = arith.addf %15, %16 : vector<1x100xf32>
    %c0_7 = arith.constant 0 : index
    %c0_8 = arith.constant 0 : index
    %18 = vector.load %arg2[%c0_7, %c0_8] : memref<1x100xf32, #tpu.memory_space<vmem>>, vector<1x100xf32>
    tpu.vector_store %arg2[%c0_7, %c0_8], %17 {strides = array<i32>} : memref<1x100xf32, #tpu.memory_space<vmem>>, vector<1x100xf32>,
    return
  }
}

</mosaic_0001>

<bundles_post_ra>
// kernel: tpu_custom_call.1
= control target key start
LH: loop header
LB: loop body
LE: loop exit
PB: predicated region body
PF: predicated region fallthrough
CT: control target
= control target key end

     0   :  { %v167_v2 = vmov 0   ;;  %s217_s0 = inlined_call_operand.vmem [shape: f32[1,100], index: 0, kind: input, shape index: {}]   ;;  %s218_s1 = inlined_call_operand.vmem [shape: f32[32,4], index: 1, kind: input, shape index: {}]   ;;  %s219_s2 = inlined_call_operand.hbm [shape: f32[1,100], index: 2, kind: output, shape index: {}]  }
   0x1   :  { %v15_v0 = vld [vmem:[%s218_s1 + $0x10] sm:$0xff]  ;;  %v13_v1 = vld [vmem:[%s218_s1] sm:$0xff]  ;;  %135 = vset.pattern.permute.xlu1 %v167_v2  ;;  %134 = vset.pattern.permute.xlu0 %v167_v2 }
   0x2   :  { %30 = vperm.xlu1 %135, %v15_v0   ;;  %20 = vperm.xlu0 %134, %v13_v1  }
   0x3   :  { %7 = vsyncpa [#allocation3], 0  ;;  %v14_v3 = vld [vmem:[%s218_s1 + $0x8] sm:$0xff]  ;;  %v168_v4 = vmov 1   ;;  %v16_v5 = vld [vmem:[%s218_s1 + $0x18] sm:$0xff]  ;;  %v169_v6 = vmov 2  }
   0x4   :  { %v17_v7 = vld [vmem:[%s218_s1] sm:$0x1]  ;;  %v170_v8 = vmov 3   ;;  %vm92_vm0 = vcmask 818176   ;;  %vm112_vm1 = vcmask 811008  }
   0x5   :  { %v128_v14 = vld [vmem:[%s217_s0] ss:$0 sm:$0xff]  ;;  %s171_s0 = smov [#allocation2]  }
   0x6   :  { %136 = vset.pattern.permute.xlu1 %v168_v4  ;;  %25 = vperm.xlu0 %134, %v14_v3   ;;  %s120_s1 = sshll.u32 %s171_s0, 4  ;;  %s121_s1 = int_to_ptr.vmem [resolvable:$true] %s120_s1 }
   0x7   :  { %49 = vperm.xlu1 %136, %v13_v1   ;;  %s143_s21 = scalar_lea.vmem %s121_s1, 16  ;;  %s147_s22 = scalar_lea.vmem %s121_s1, 32 }
   0x8   :  { %p144_p0 = scmp.ne.s32.totalorder %s121_s1, %s143_s21  ;;  %p148_p1 = scmp.lt.s32.totalorder %s121_s1, %s121_s1 }
   0x9   :  { %p149_p2 = scmp.lt.s32.totalorder %s147_s22, %s143_s21 }
   0xa   :  { %137 = vset.pattern.permute.xlu0 %v168_v4 }
   0xb   :  { %138 = vset.pattern.permute.xlu1 %v167_v2  ;;  %53 = vperm.xlu0 %137, %v14_v3   ;;  %p150_p3 = por %p149_p2, %p148_p1 }
   0xc   :  { %35 = vperm.xlu1 %138, %v16_v5  }
   0xd   :  { %p151_p4 = pnand %p150_p3, %p144_p0 }
   0xf   :  { %61 = vperm.xlu0 %137, %v16_v5  }
  0x10   :  { %139 = vset.pattern.permute.xlu1 %v168_v4 }
  0x11   :  { %57 = vperm.xlu1 %139, %v15_v0  }
  0x13   :  { %141 = vset.pattern.permute.xlu0 %v169_v6 }
  0x14   :  { %77 = vperm.xlu0 %141, %v14_v3  }
  0x15   :  { %140 = vset.pattern.permute.xlu1 %v169_v6 }
  0x16   :  { %73 = vperm.xlu1 %140, %v13_v1  }
  0x18   :  { %142 = vset.pattern.permute.xlu0 %v170_v8 }
  0x19   :  { %108 = vperm.xlu0 %142, %v17_v7  }
  0x1a   :  { %81 = vperm.xlu1 %140, %v15_v0  }
  0x1e   :  { %85 = vperm.xlu1 %140, %v16_v5  }
  0x81   :  { %v31_v9 = vpop.permute.xlu1 %30  ;;  %v21_v10 = vpop.permute.xlu0 %20 }
  0x82   :  { %v44_v16 = vmul.f32 %v128_v14, %v21_v10  ;;  %v46_v21 = vmul.f32 %v128_v14, %v31_v9 }
  0x85   :  { %v26_v11 = vpop.permute.xlu0 %25 }
  0x86   :  { %v50_v12 = vpop.permute.xlu1 %49  ;;  %v45_v17 = vmul.f32 %v128_v14, %v26_v11 }
  0x87   :  { %v64_v19 = vadd.f32 %v50_v12, %v44_v16 }
  0x89   :  { %v68_v23 = vmax.f32 %v64_v19, 0.0 }
  0x8a   :  { %v54_v13 = vpop.permute.xlu0 %53 }
  0x8b   :  { %v36_v15 = vpop.permute.xlu1 %35  ;;  %v65_v22 = vadd.f32 %v54_v13, %v45_v17 }
  0x8c   :  { %v47_v24 = vmul.f32 %v128_v14, %v36_v15 }
  0x8d   :  { %v69_v28 = vmax.f32 %v65_v22, 0.0 }
  0x8e   :  { %v62_v18 = vpop.permute.xlu0 %61 }
  0x8f   :  { %v67_v30 = vadd.f32 %v62_v18, %v47_v24 }
  0x90   :  { %v58_v20 = vpop.permute.xlu1 %57 }
  0x91   :  { %v66_v25 = vadd.f32 %v58_v20, %v46_v21  ;;  %v71_v36 = vmax.f32 %v67_v30, 0.0 }
  0x93   :  { %v78_v26 = vpop.permute.xlu0 %77  ;;  %v70_v31 = vmax.f32 %v66_v25, 0.0 }
  0x94   :  { %v89_v32 = vmul.f32 %v78_v26, %v69_v28 }
  0x95   :  { %v74_v27 = vpop.permute.xlu1 %73 }
  0x96   :  { %v88_v29 = vmul.f32 %v74_v27, %v68_v23  ;;  %v94_v37 = vsel %vm92_vm0, %v89_v32, 0.0 }
  0x98   :  { %v93_v34 = vsel %vm92_vm0, %v88_v29, 0.0  ;;  %v109_v50 = vpop.permute.xlu0 %108 }
  0x99   :  { %v82_v33 = vpop.permute.xlu1 %81  ;;  %v95_v39 = vadd.f32 %v94_v37, %v93_v34 }
  0x9a   :  { %v90_v35 = vmul.f32 %v82_v33, %v70_v31 }
  0x9c   :  { %v96_v38 = vsel %vm92_vm0, %v90_v35, 0.0 }
  0x9d   :  { %v86_v40 = vpop.permute.xlu1 %85  ;;  %v97_v42 = vadd.f32 %v96_v38, %v95_v39 }
  0x9e   :  { %v91_v41 = vmul.f32 %v86_v40, %v71_v36 }
  0xa0   :  { %v98_v43 = vsel %vm92_vm0, %v91_v41, 0.0 }
  0xa1   :  { %v99_v44 = vadd.f32 %v98_v43, %v97_v42 }
  0xa3   :  { %v100_v45 = vrot.slane %v99_v44, 4 }
  0xa5   :  { %v101_v46 = vadd.f32 %v100_v45, %v99_v44 }
  0xa7   :  { %v102_v47 = vrot.slane %v101_v46, 2 }
  0xa9   :  { %v103_v48 = vadd.f32 %v102_v47, %v101_v46 }
  0xab   :  { %v104_v49 = vrot.slane %v103_v48, 1 }
  0xad   :  { %v105_v51 = vadd.f32 %v104_v49, %v103_v48 }
  0xaf   :  { %v111_v52 = vadd.f32 %v109_v50, %v105_v51 }
  0xb1   :  { %113 = vst.msk [vmem:[#allocation2] sm:$0x1] %vm112_vm1, %v111_v52 }
  0xb2   :  { %154 = shalt.err (!%p151_p4)
}
  0xb3   :  { %s155_s25 = scalar_lea.hbm %s219_s2, 16 }
  0xb4   :  { %p156_p5 = scmp.ne.s32.totalorder %s219_s2, %s155_s25  ;;  %p159_p6 = scmp.lt.u32.totalorder %s155_s25, %s219_s2 }
  0xb6   :  { %p161_p7 = pnand %p159_p6, %p156_p5 }
  0xb8   :  { %164 = shalt.err (!%p161_p7)
}
  0xb9   :  { %123 = dma.vmem_to_hbm [thread:$0]  %s121_s1, 16, %s219_s2, [#allocation3]  }
  0xba   :  { %165 = dma.done.wait [#allocation3], 16  }
  0xbb   :  { %166 = vsyncadd [#allocation3], 4294967280 }
  0xbc   :  { %127 = vsyncpa [#allocation3], 1 }

</bundles_post_ra>
